<compile_context>
chip_gen: v6e
topology: v6e:2x2x1
jax: 0.10.0
libtpu: 0.0.40
codegen_flags: <defaults>
</compile_context>

<pallas_src>
import jax
import jax.numpy as jnp
from jax.experimental import pallas as pl
from jax.experimental.pallas import tpu as pltpu

LN_EPS = 1e-5  # nn.LayerNorm default


def _mlp_time_kernel(x_ref, wt_ref, b_ref, o_ref):
    # x_ref : (1, t_in, Lt)   time on sublanes, fused spatial axis on lanes
    # wt_ref: (t_out, t_in)   = (gamma[:,None] * W).T
    # b_ref : (t_out, 1)      = beta @ W + bias
    # o_ref : (1, t_out, Lt)
    x = x_ref[0].astype(jnp.float32)                       # (t_in, Lt)

    # LayerNorm over the time axis (axis 0 here) — biased variance, PyTorch-style.
    mean = jnp.mean(x, axis=0, keepdims=True)              # (1, Lt)
    centered = x - mean
    var = jnp.mean(centered * centered, axis=0, keepdims=True)
    xn = centered * jax.lax.rsqrt(var + LN_EPS)            # affine folded into W'/b'

    # Linear (+ folded affine) + ReLU on the MXU, lane-dense output.
    y = jnp.dot(wt_ref[...].astype(jnp.float32), xn,
                preferred_element_type=jnp.float32)        # (t_out, Lt)
    y = y + b_ref[...].astype(jnp.float32)
    o_ref[0] = jnp.maximum(y, 0.0).astype(o_ref.dtype)


def _choose_l_tile(l, max_tile):
    """Pick a lane-tile: full extent if small, else a 128-multiple (divisor if possible)."""
    if l <= max_tile:
        return l                                  # full-extent block is always legal
    cap = (max_tile // 128) * 128
    for cand in range(cap, 127, -128):            # prefer an exact divisor (no ragged block)
        if l % cand == 0:
            return cand
    return cap                                    # ragged last block; OOB writes are masked


def mlp_time_grid(x, gamma, beta, w, bias, *, max_l_tile=8192):
    """Full module forward.  x: (b, t_in, c, h, w) -> (b, t_out, c, h, w)."""
    b, t_in, c, h, w_sp = x.shape
    t_out = w.shape[1]
    l = c * h * w_sp

    # Zero-copy relayout: keep native memory order, just fuse the spatial dims.
    x3 = x.reshape(b, t_in, l)

    # Fold LayerNorm affine into the linear layer:
    #   ((x-mu)*r*gamma + beta) @ W + bias == (x-mu)*r @ (gamma[:,None]*W) + (beta@W + bias)
    w_f32 = w.astype(jnp.float32)
    wt = (w_f32 * gamma.astype(jnp.float32)[:, None]).T                    # (t_out, t_in)
    b2 = (beta.astype(jnp.float32) @ w_f32
          + bias.astype(jnp.float32)).reshape(t_out, 1)                    # (t_out, 1)

    max_tile = max_l_tile
    if b == 1 and l > 256 and l % 256 == 0:
        max_tile = min(max_tile, l // 2)   # keep >=2 grid steps for v7x's 2 TensorCores
    l_tile = _choose_l_tile(l, max_tile)
    n_l = pl.cdiv(l, l_tile)

    n_rows = b * l
    itemsize = jnp.dtype(x.dtype).itemsize
    cost = pl.CostEstimate(
        flops=int(2 * n_rows * t_in * t_out + 5 * n_rows * t_in),
        transcendentals=int(n_rows),                       # rsqrt per spatial location
        bytes_accessed=int(n_rows * (t_in + t_out) * itemsize
                           + (t_out * t_in + t_out) * 4),
    )

    out = pl.pallas_call(
        _mlp_time_kernel,
        out_shape=jax.ShapeDtypeStruct((b, t_out, l), x.dtype),
        grid_spec=pltpu.PrefetchScalarGridSpec(
            num_scalar_prefetch=0,
            grid=(b, n_l),
            in_specs=[
                pl.BlockSpec((1, t_in, l_tile), lambda i, j: (i, 0, j)),
                pl.BlockSpec((t_out, t_in), lambda i, j: (0, 0)),
                pl.BlockSpec((t_out, 1), lambda i, j: (0, 0)),
            ],
            out_specs=pl.BlockSpec((1, t_out, l_tile), lambda i, j: (i, 0, j)),
        ),
        compiler_params=pltpu.CompilerParams(
            dimension_semantics=("parallel", "parallel")),
        cost_estimate=cost,
    )(x3, wt, b2)

    return out.reshape(b, t_out, c, h, w_sp)


def _reference(x, gamma, beta, w, bias):
    """Pure-JAX reference following the PyTorch module literally."""
    b, t, c, h, w_sp = x.shape
    xt = jnp.transpose(x, (0, 2, 3, 4, 1)).reshape(-1, t).astype(jnp.float32)
    mean = jnp.mean(xt, axis=-1, keepdims=True)
    var = jnp.mean((xt - mean) ** 2, axis=-1, keepdims=True)
    xn = (xt - mean) * jax.lax.rsqrt(var + LN_EPS) * gamma + beta
    y = jnp.maximum(xn @ w + bias, 0.0)
    y = y.reshape(b, c, h, w_sp, -1)
    return jnp.transpose(y, (0, 4, 1, 2, 3))


if __name__ == "__main__":
    key = jax.random.PRNGKey(0)
    k_x, k_g, k_b, k_w, k_bb = jax.random.split(key, 5)

    # Small shapes: batch=2, t_in=8 time steps, channels=4, spatial=8x8, t_out=16.
    b, t_in, c, h, w_sp = 2, 8, 4, 8, 8
    t_out = 16

    x = jax.random.normal(k_x, (b, t_in, c, h, w_sp), dtype=jnp.float32)

    # Deterministic synthetic parameters (LayerNorm: gamma/beta; Linear: W/bias).
    gamma = 1.0 + 0.1 * jax.random.normal(k_g, (t_in,), dtype=jnp.float32)
    beta = 0.1 * jax.random.normal(k_b, (t_in,), dtype=jnp.float32)
    w = jax.random.normal(k_w, (t_in, t_out), dtype=jnp.float32) / jnp.sqrt(t_in)
    bias = 0.1 * jax.random.normal(k_bb, (t_out,), dtype=jnp.float32)

    out = jax.jit(mlp_time_grid)(x, gamma, beta, w, bias)
    out = jax.block_until_ready(out)

    ref = _reference(x, gamma, beta, w, bias)
    assert out.shape == (b, t_out, c, h, w_sp), out.shape
    # Folding the LN affine into W'/b' only reassociates fp math; keep a safe tolerance.
    assert jnp.allclose(out, ref, atol=1e-4, rtol=1e-4), float(jnp.max(jnp.abs(out - ref)))

    print("KERNEL_OK")
</pallas_src>

<mosaic_0001>
module attributes {stable_mosaic.version = 11 : i64} {
  func.func @_mlp_time_kernel(%arg0: i32, %arg1: i32, %arg2: memref<1x8x256xf32, #tpu.memory_space<vmem>>, %arg3: memref<16x8xf32, #tpu.memory_space<vmem>>, %arg4: memref<16x1xf32, #tpu.memory_space<vmem>>, %arg5: memref<1x16x256xf32, #tpu.memory_space<vmem>>) attributes {dimension_semantics = [#tpu.dimension_semantics<parallel>, #tpu.dimension_semantics<parallel>], iteration_bounds = array<i64: 2, 1>, scalar_prefetch = 0 : i64, scratch_operands = 0 : i64, tpu.core_type = #tpu.core_type<tc>, window_params = [{transform_indices = @transform_0, window_bounds = array<i64: 1, 8, 256>}, {pipeline_mode = #tpu.pipeline_mode<synchronous>, transform_indices = @transform_1, window_bounds = array<i64: 16, 8>}, {pipeline_mode = #tpu.pipeline_mode<synchronous>, transform_indices = @transform_2, window_bounds = array<i64: 16, 1>}, {transform_indices = @transform_3, window_bounds = array<i64: 1, 16, 256>}]} {
    %c0 = arith.constant 0 : index
    %c0_0 = arith.constant 0 : index
    %c0_1 = arith.constant 0 : index
    %0 = vector.load %arg2[%c0, %c0_0, %c0_1] : memref<1x8x256xf32, #tpu.memory_space<vmem>>, vector<1x8x256xf32>
    %1 = vector.shape_cast %0 : vector<1x8x256xf32> to vector<8x256xf32>
    %cst = arith.constant dense<0.000000e+00> : vector<256xf32>
    %2 = vector.multi_reduction <add>, %1, %cst [0] : vector<8x256xf32> to vector<256xf32>
    %3 = vector.shape_cast %2 : vector<256xf32> to vector<1x256xf32>
    %cst_2 = arith.constant 8.000000e+00 : f32
    %4 = vector.broadcast %cst_2 : f32 to vector<1x256xf32>
    %5 = arith.divf %3, %4 : vector<1x256xf32>
    %6 = vector.broadcast %5 : vector<1x256xf32> to vector<8x256xf32>
    %7 = arith.subf %1, %6 : vector<8x256xf32>
    %8 = arith.mulf %7, %7 : vector<8x256xf32>
    %cst_3 = arith.constant dense<0.000000e+00> : vector<256xf32>
    %9 = vector.multi_reduction <add>, %8, %cst_3 [0] : vector<8x256xf32> to vector<256xf32>
    %10 = vector.shape_cast %9 : vector<256xf32> to vector<1x256xf32>
    %cst_4 = arith.constant 8.000000e+00 : f32
    %11 = vector.broadcast %cst_4 : f32 to vector<1x256xf32>
    %12 = arith.divf %10, %11 : vector<1x256xf32>
    %cst_5 = arith.constant 9.99999974E-6 : f32
    %13 = vector.broadcast %cst_5 : f32 to vector<1x256xf32>
    %14 = arith.addf %12, %13 : vector<1x256xf32>
    %15 = math.rsqrt %14 : vector<1x256xf32>
    %16 = vector.broadcast %15 : vector<1x256xf32> to vector<8x256xf32>
    %17 = arith.mulf %7, %16 : vector<8x256xf32>
    %c0_6 = arith.constant 0 : index
    %c0_7 = arith.constant 0 : index
    %18 = vector.load %arg3[%c0_6, %c0_7] : memref<16x8xf32, #tpu.memory_space<vmem>>, vector<16x8xf32>
    %cst_8 = arith.constant dense<0.000000e+00> : vector<16x256xf32>
    %19 = tpu.matmul %18, %17, %cst_8 {dimension_numbers = #tpu.dot_dimension_numbers<[1], [0], [0], [1], [0, 0, 1, 1], [], []>} : vector<16x8xf32>, vector<8x256xf32>, vector<16x256xf32> -> vector<16x256xf32>
    %c0_9 = arith.constant 0 : index
    %c0_10 = arith.constant 0 : index
    %20 = vector.load %arg4[%c0_9, %c0_10] : memref<16x1xf32, #tpu.memory_space<vmem>>, vector<16x1xf32>
    %21 = vector.broadcast %20 : vector<16x1xf32> to vector<16x256xf32>
    %22 = arith.addf %19, %21 : vector<16x256xf32>
    %cst_11 = arith.constant 0.000000e+00 : f32
    %23 = vector.broadcast %cst_11 : f32 to vector<16x256xf32>
    %24 = arith.maximumf %22, %23 : vector<16x256xf32>
    %c0_12 = arith.constant 0 : index
    %c0_13 = arith.constant 0 : index
    %c0_14 = arith.constant 0 : index
    %25 = vector.load %arg5[%c0_12, %c0_13, %c0_14] : memref<1x16x256xf32, #tpu.memory_space<vmem>>, vector<1x16x256xf32>
    %26 = vector.shape_cast %25 : vector<1x16x256xf32> to vector<16x256xf32>
    %27 = vector.shape_cast %24 : vector<16x256xf32> to vector<1x16x256xf32>
    tpu.vector_store %arg5[%c0_12, %c0_13, %c0_14], %27 {strides = array<i32>} : memref<1x16x256xf32, #tpu.memory_space<vmem>>, vector<1x16x256xf32>,
    return
  }
  func.func @transform_0(%arg0: i32, %arg1: i32) -> (i32, i32, i32) {
    %c0_i32 = arith.constant 0 : i32
    %c0_i32_0 = arith.constant 0 : i32
    return %arg0, %c0_i32, %arg1 : i32, i32, i32
  }
  func.func @transform_1(%arg0: i32, %arg1: i32) -> (i32, i32) {
    %c0_i32 = arith.constant 0 : i32
    %c0_i32_0 = arith.constant 0 : i32
    %c0_i32_1 = arith.constant 0 : i32
    return %c0_i32, %c0_i32_0 : i32, i32
  }
  func.func @transform_2(%arg0: i32, %arg1: i32) -> (i32, i32) {
    %c0_i32 = arith.constant 0 : i32
    %c0_i32_0 = arith.constant 0 : i32
    %c0_i32_1 = arith.constant 0 : i32
    return %c0_i32, %c0_i32_0 : i32, i32
  }
  func.func @transform_3(%arg0: i32, %arg1: i32) -> (i32, i32, i32) {
    %c0_i32 = arith.constant 0 : i32
    %c0_i32_0 = arith.constant 0 : i32
    return %arg0, %c0_i32, %arg1 : i32, i32, i32
  }
}

</mosaic_0001>

<bundles_post_ra>
// kernel: mlp_time_grid.1
= control target key start
LH: loop header
LB: loop body
LE: loop exit
PB: predicated region body
PF: predicated region fallthrough
CT: control target
= control target key end

     0   :  { %s538_s12 = smov 0   ;;  %s540_s13 = smov 0   ;;  %s587_s0 = inlined_call_operand.vmem [shape: f32[2,8,256], index: 0, kind: input, shape index: {}]   ;;  %s588_s1 = inlined_call_operand.vmem [shape: f32[16,8], index: 1, kind: input, shape index: {}]   ;;  %s589_s2 = inlined_call_operand.vmem [shape: f32[16,1], index: 2, kind: input, shape index: {}]   ;;  %s590_s3 = inlined_call_operand.vmem [shape: f32[2,16,256], index: 3, kind: output, shape index: {}]  }
   0x1   :  { %s542_s14 = smov 0  }
   0x2 LB: > { %s25_s15 = sadd.s32 1, %s510_s13  ;;  %p448_p0 = scmp.ge.s32.totalorder %s514_s14, 1  ;;  %s514_s14 = sphi %s542_s14, %s13_s14   ;;  %s510_s13 = sphi %s540_s13, %s592_s13   ;;  %s506_s12 = sphi %s538_s12, %s591_s12  }
   0x3   : > { %p27_p1 = scmp.ge.s32.totalorder %s25_s15, 2  ;;  %p158_p2 = scmp.lt.s32.totalorder %s514_s14, 3 }
   0x5   : > { %s594_s15 = smov (%p27_p1, %s25_s15), 0  ;;  %p159_p3 = pnand %p448_p0, %p158_p2 }
   0x6   : > { %p191_p4 = scmp.lt.s32.totalorder (!%p159_p3), %s506_s12, 1 }
   0x7   : > { %162 = sbr.rel (%p159_p3) target bundleno = 268 (0x10c), region = 32 }
   0xc   : > { %v516_v0 = vmov 0.0   ;;  %v253_v1 = vld [vmem:[%s589_s2] sm:$0xff]  ;;  %s596_s12 = smov (!%p191_p4, %s506_s12), 1  ;;  %v517_v2 = vmov 0   ;;  %v254_v3 = vld [vmem:[%s589_s2 + $0x8] sm:$0xff]  ;;  %vm265_vm0 = vcmask 64512  }
   0xd   : > { %336 = vmatprep.mubr.f32.mxu0 %v516_v0  ;;  %342 = vmatprep.mubr.f32.mxu1 %v516_v0  ;;  %s457_s18 = sshll.u32 %s596_s12, 4  ;;  %v251_v44 = vld [vmem:[%s588_s1] sm:$0xff]  ;;  %v252_v45 = vld [vmem:[%s588_s1 + $0x8] sm:$0xff]  ;;  %s458_s28 = sshll.u32 %s596_s12, 5 }
   0xe   : > { %487 = vset.pattern.permute.xlu0 %v517_v2  ;;  %s198_s23 = scalar_lea.vmem %s587_s0, %s457_s18  ;;  %s208_s4 = scalar_lea.vmem %s590_s3, %s458_s28 }
   0xf   : > { %257 = vperm.xlu0 %487, %v253_v1   ;;  %v211_v4 = vld [vmem:[%s198_s23 + $0x8] sm:$0xff]  ;;  %v210_v5 = vld [vmem:[%s198_s23] sm:$0xff] }
  0x10   : > { %v218_v6 = vrot.slane %v211_v4, 4  ;;  %v212_v7 = vrot.slane %v210_v5, 4 }
  0x12   : > { %v219_v8 = vadd.f32 %v218_v6, %v211_v4  ;;  %v213_v9 = vadd.f32 %v212_v7, %v210_v5 }
  0x13   : > { %262 = vperm.xlu0 %487, %v254_v3  }
  0x14   : > { %v220_v10 = vrot.slane %v219_v8, 2  ;;  %v214_v11 = vrot.slane %v213_v9, 2 }
  0x16   : > { %v221_v12 = vadd.f32 %v220_v10, %v219_v8  ;;  %v215_v13 = vadd.f32 %v214_v11, %v213_v9 }
  0x18   : > { %v222_v14 = vrot.slane %v221_v12, 1  ;;  %v216_v15 = vrot.slane %v215_v13, 1 }
  0x1a   : > { %v223_v16 = vadd.f32 %v222_v14, %v221_v12  ;;  %v217_v17 = vadd.f32 %v216_v15, %v215_v13 }
  0x1c   : > { %v226_v18 = vmul.f32 0.125, %v223_v16  ;;  %v225_v19 = vmul.f32 0.125, %v217_v17 }
  0x1e   : > { %v228_v20 = vsub.f32 %v211_v4, %v226_v18  ;;  %v227_v21 = vsub.f32 %v210_v5, %v225_v19 }
  0x20   : > { %v230_v22 = vmul.f32 %v228_v20, %v228_v20  ;;  %v229_v23 = vmul.f32 %v227_v21, %v227_v21 }
  0x22   : > { %v237_v24 = vrot.slane %v230_v22, 4  ;;  %v231_v25 = vrot.slane %v229_v23, 4 }
  0x24   : > { %v238_v26 = vadd.f32 %v237_v24, %v230_v22  ;;  %v232_v27 = vadd.f32 %v231_v25, %v229_v23 }
  0x26   : > { %v239_v28 = vrot.slane %v238_v26, 2  ;;  %v233_v29 = vrot.slane %v232_v27, 2 }
  0x28   : > { %v240_v30 = vadd.f32 %v239_v28, %v238_v26  ;;  %v234_v31 = vadd.f32 %v233_v29, %v232_v27 }
  0x2a   : > { %v241_v32 = vrot.slane %v240_v30, 1  ;;  %v235_v33 = vrot.slane %v234_v31, 1 }
  0x2c   : > { %v242_v34 = vadd.f32 %v241_v32, %v240_v30  ;;  %v236_v35 = vadd.f32 %v235_v33, %v234_v31 }
  0x2e   : > { %v244_v36 = vmul.f32 0.125, %v242_v34  ;;  %v243_v37 = vmul.f32 0.125, %v236_v35 }
  0x30   : > { %v246_v38 = vadd.f32 1e-05, %v244_v36  ;;  %v245_v39 = vadd.f32 1e-05, %v243_v37 }
  0x32   : > { %488 = vrsqrt.f32 %v246_v38 }
  0x33   : > { %490 = vrsqrt.f32 %v245_v39 }
  0x3f   : > { %v489_v40 = vpop.eup %488 }
  0x40   : > { %v491_v41 = vpop.eup %490  ;;  %v250_v42 = vmul.f32 %v489_v40, %v228_v20 }
  0x41   : > { %v249_v43 = vmul.f32 %v491_v41, %v227_v21 }
  0x42   : > { %302 = vmatprep.subr.mxu0 %v250_v42  ;;  %459 = vmatprep.subr.mxu1 %v250_v42 }
  0x43   : > { %303 = vmatpush1.msra.mxu0 %v249_v43  ;;  %460 = vmatpush1.msra.mxu1 %v249_v43 }
  0x44   : > { %453 = vmatmul.mubr.msk.f32.vlgmr.msra.gmra.mxu0 %vm265_vm0, %v251_v44  ;;  %454 = vmatmul.mubr.msk.f32.vlgmr.msra.gmra.mxu1 %vm265_vm0, %v252_v45 }
  0x8a   : > { %v258_v46 = vpop.permute.xlu0 %257 }
  0x8e   : > { %v263_v47 = vpop.permute.xlu0 %262 }
 0x104   : > { %v338_v48 = vpop.f32.mrf.mxu0  ;;  %v344_v49 = vpop.f32.mrf.mxu1 }
 0x105   : > { %v339_v50 = vadd.f32 %v338_v48, %v258_v46  ;;  %v345_v51 = vadd.f32 %v344_v49, %v263_v47 }
 0x106   : > { %v340_v52 = vpop.f32.mrf.mxu0  ;;  %v346_v53 = vpop.f32.mrf.mxu1 }
 0x107   : > { %v349_v54 = vmax.f32 %v339_v50, 0.0  ;;  %v351_v55 = vmax.f32 %v345_v51, 0.0  ;;  %v341_v56 = vadd.f32 %v340_v52, %v258_v46  ;;  %v347_v57 = vadd.f32 %v346_v53, %v263_v47 }
 0x109   : > { %353 = vst [vmem:[%s208_s4] sm:$0xff] %v349_v54  ;;  %355 = vst [vmem:[%s208_s4 + $0x10] sm:$0xff] %v351_v55  ;;  %v350_v58 = vmax.f32 %v341_v56, 0.0  ;;  %v352_v59 = vmax.f32 %v347_v57, 0.0 }
 0x10b   : > { %354 = vst [vmem:[%s208_s4 + $0x8] sm:$0xff] %v350_v58  ;;  %356 = vst [vmem:[%s208_s4 + $0x18] sm:$0xff] %v352_v59 }
 0x10c PF: > { %s13_s14 = sadd.s32 1, %s514_s14   ;;  %s591_s12 = smov %s510_s13 }
 0x10d   : > { %p10_p5 = scmp.ge.s32.totalorder %s13_s14, 4   ;;  %s592_s13 = smov %s594_s15 }
 0x10f   :  { %12 = sbr.rel (!%p10_p5) target bundleno = 2 (0x2), region = 62 }

</bundles_post_ra>
